<compile_context>
chip_gen: v7x
topology: tpu7x:2x2x1
jax: 0.10.0
libtpu: 0.0.40
codegen_flags: <defaults>
</compile_context>

<pallas_src>
import functools

import jax
import jax.numpy as jnp
from jax.experimental import pallas as pl
from jax.experimental.pallas import tpu as pltpu

LANES = 128
SUBLANES = 8
# Per-input, per-grid-step block byte budget (~2 MiB keeps an f32 stream near
# the HBM roofline; 2 inputs x 2 pipeline buffers = 8 MiB of VMEM).
TARGET_BLOCK_BYTES = 2 * 1024 * 1024
# In-kernel sub-chunk byte budget for the f32 diff/sq temporaries.
TARGET_CHUNK_BYTES = 256 * 1024
VMEM_LIMIT_BYTES = 32 * 1024 * 1024
# Below this many elements, skip the pallas_call (launch overhead dominates).
MIN_PALLAS_ELEMS = 1 << 20


def _mse_partial_kernel(v_ref, r_ref, o_ref, *, tile_rows, chunk_rows,
                        total_rows, ragged):
    """Accumulate a lane-dense (8, 128) partial sum of (v - r)^2."""
    i = pl.program_id(0)

    @pl.when(i == 0)
    def _():
        o_ref[...] = jnp.zeros_like(o_ref)

    row0 = i * tile_rows  # first global row covered by this block
    acc = jnp.zeros((SUBLANES, LANES), jnp.float32)

    # Static sub-chunk loop: bounds the f32 temporaries to chunk_rows x 128.
    c0 = 0
    while c0 < tile_rows:
        csz = min(chunk_rows, tile_rows - c0)          # static, multiple of 8
        v = v_ref[c0:c0 + csz, :].astype(jnp.float32)  # upcast in-kernel
        r = r_ref[c0:c0 + csz, :].astype(jnp.float32)
        d = v - r
        sq = d * d
        if ragged:
            # Rows at/after `total_rows` belong to the clamped edge-block DMA
            # and contain unspecified garbage -> zero them before accumulating.
            rid = jax.lax.broadcasted_iota(jnp.int32, (csz, LANES), 0)
            sq = jnp.where(rid < (total_rows - row0 - c0), sq, 0.0)
        # Reduce only across the leading (vreg-count) axis: pure VPU adds, no
        # cross-lane/sublane XLU work in the hot loop.
        acc = acc + sq.reshape(csz // SUBLANES, SUBLANES, LANES).sum(axis=0)
        c0 += csz

    o_ref[...] += acc


def value_loss(values: jax.Array, reward: jax.Array,
               *, min_pallas_elems: int = MIN_PALLAS_ELEMS) -> jax.Array:
    """MSE loss: ((values - reward) ** 2).mean()."""
    assert values.shape == reward.shape, "broadcasting not needed for this module"
    n = values.size
    if n == 0:
        return jnp.float32(float("nan"))  # matches torch .mean() of empty

    itemsize = jnp.dtype(values.dtype).itemsize
    # Sublane packing: 8 rows for f32, 16 for bf16, 32 for int8/fp8.
    row_align = SUBLANES * max(1, 4 // max(itemsize, 1))

    rows = -(-n // LANES)  # ceil-div: rows of the lane-dense (rows, 128) view

    # Small-input fallback: launch overhead + the extra final reduce dominate.
    if n < min_pallas_elems or rows < row_align:
        d = values.astype(jnp.float32) - reward.astype(jnp.float32)
        return jnp.mean(d * d)

    v_flat = values.reshape(-1)  # row-major flatten: free bitcast, no copy
    r_flat = reward.reshape(-1)

    lane_rem = n % LANES
    if lane_rem:
        # TODO(synk): a manual 1D-DMA kernel would avoid this copy entirely;
        # here we only pad to the next lane multiple (< 128 zeros, which
        # contribute 0 to the sum), never to a whole tile/chunk.
        pad = LANES - lane_rem
        v_flat = jnp.pad(v_flat, (0, pad))
        r_flat = jnp.pad(r_flat, (0, pad))
    v2d = v_flat.reshape(rows, LANES)
    r2d = r_flat.reshape(rows, LANES)

    # Tile selection: biggest lane-dense block within the byte budget, a
    # multiple of the sublane packing, and never larger than the array — so
    # the only raggedness is the final partial block, masked in-kernel.
    budget_rows = max(row_align, (TARGET_BLOCK_BYTES // (LANES * itemsize))
                      // row_align * row_align)
    tile_rows = min(budget_rows, (rows // row_align) * row_align)
    steps = -(-rows // tile_rows)
    ragged = (rows % tile_rows) != 0
    chunk_rows = min(tile_rows,
                     max(row_align, (TARGET_CHUNK_BYTES // (LANES * 4))
                         // row_align * row_align))

    kernel = functools.partial(
        _mse_partial_kernel, tile_rows=tile_rows, chunk_rows=chunk_rows,
        total_rows=rows, ragged=ragged)

    partials = pl.pallas_call(
        kernel,
        out_shape=jax.ShapeDtypeStruct((SUBLANES, LANES), jnp.float32),
        grid_spec=pltpu.PrefetchScalarGridSpec(
            num_scalar_prefetch=0,
            grid=(steps,),
            in_specs=[
                pl.BlockSpec((tile_rows, LANES), lambda i: (i, 0)),
                pl.BlockSpec((tile_rows, LANES), lambda i: (i, 0)),
            ],
            # Output doubles as the accumulator: same block every step, so it
            # stays resident in VMEM across the whole reduction.
            out_specs=pl.BlockSpec((SUBLANES, LANES), lambda i: (0, 0)),
        ),
        # TODO(synk): v7x 2-TensorCore split (CORE_PARALLEL leading axis) not
        # wired up; a single-core reduction grid is optimal on v5e/v6e.
        compiler_params=pltpu.CompilerParams(
            dimension_semantics=("arbitrary",),
            vmem_limit_bytes=VMEM_LIMIT_BYTES,
        ),
    )(v2d, r2d)

    # Tiny (8x128) final reduction + mean in the wrapper.
    return jnp.sum(partials) / jnp.float32(n)


if __name__ == "__main__":
    key = jax.random.PRNGKey(0)
    k1, k2, k3, k4, k5, k6 = jax.random.split(key, 6)

    # 1) Small value-head-like shape (batch=2, channels=4, 16x16): default path
    #    is the small-input fallback; also force the kernel path.
    v1 = jax.random.normal(k1, (2, 4, 16, 16), dtype=jnp.float32)
    r1 = jax.random.normal(k2, (2, 4, 16, 16), dtype=jnp.float32)
    ref1 = jnp.mean((v1 - r1) ** 2)
    out_fb = value_loss(v1, r1)                       # fallback path
    out_k = value_loss(v1, r1, min_pallas_elems=0)    # forced kernel path
    jax.block_until_ready((out_fb, out_k))
    assert jnp.allclose(out_fb, ref1, rtol=1e-4, atol=1e-6), (out_fb, ref1)
    assert jnp.allclose(out_k, ref1, rtol=1e-4, atol=1e-6), (out_k, ref1)

    # 2) Unaligned shape (n % 128 != 0, ragged last block): exercises the
    #    in-kernel row masking and the minimal lane pad.
    v2 = jax.random.normal(k3, (3, 5, 17, 19), dtype=jnp.float32)
    r2 = jax.random.normal(k4, (3, 5, 17, 19), dtype=jnp.float32)
    ref2 = jnp.mean((v2 - r2) ** 2)
    out2 = value_loss(v2, r2, min_pallas_elems=0)
    jax.block_until_ready(out2)
    assert jnp.allclose(out2, ref2, rtol=1e-4, atol=1e-6), (out2, ref2)

    # 3) Larger unaligned shape (> 1M elements): default heuristic takes the
    #    kernel path; multi-step grid + sub-chunk loop + masked edge block.
    v3 = jax.random.normal(k5, (13, 7, 97, 127), dtype=jnp.float32)
    r3 = jax.random.normal(k6, (13, 7, 97, 127), dtype=jnp.float32)
    ref3 = jnp.mean((v3 - r3) ** 2)
    out3 = value_loss(v3, r3)
    jax.block_until_ready(out3)
    assert jnp.allclose(out3, ref3, rtol=1e-4, atol=1e-6), (out3, ref3)

    print("KERNEL_OK")
</pallas_src>

<mosaic_0001>
module attributes {stable_mosaic.version = 11 : i64} {
  func.func @_mse_partial_kernel(%arg0: i32, %arg1: memref<16x128xf32, #tpu.memory_space<vmem>>, %arg2: memref<16x128xf32, #tpu.memory_space<vmem>>, %arg3: memref<8x128xf32, #tpu.memory_space<vmem>>) attributes {dimension_semantics = [#tpu.dimension_semantics<arbitrary>], iteration_bounds = array<i64: 1>, scalar_prefetch = 0 : i64, scratch_operands = 0 : i64, tpu.core_type = #tpu.core_type<tc>, window_params = [{transform_indices = @transform_0, window_bounds = array<i64: 16, 128>}, {transform_indices = @transform_1, window_bounds = array<i64: 16, 128>}, {pipeline_mode = #tpu.pipeline_mode<synchronous>, transform_indices = @transform_2, window_bounds = array<i64: 8, 128>}]} {
    %c0_i32 = arith.constant 0 : i32
    %0 = arith.cmpi eq, %arg0, %c0_i32 : i32
    %1 = arith.extui %0 : i1 to i32
    %c0_i32_0 = arith.constant 0 : i32
    %2 = arith.cmpi ne, %1, %c0_i32_0 : i32
    scf.if %2 {
      %cst_9 = arith.constant 0.000000e+00 : f32
      %14 = vector.broadcast %cst_9 : f32 to vector<8x128xf32>
      %c0_10 = arith.constant 0 : index
      %c0_11 = arith.constant 0 : index
      %15 = vector.load %arg3[%c0_10, %c0_11] : memref<8x128xf32, #tpu.memory_space<vmem>>, vector<8x128xf32>
      tpu.vector_store %arg3[%c0_10, %c0_11], %14 {strides = array<i32>} : memref<8x128xf32, #tpu.memory_space<vmem>>, vector<8x128xf32>,
    } else {
    }
    %cst = arith.constant 0.000000e+00 : f32
    %3 = vector.broadcast %cst : f32 to vector<8x128xf32>
    %c0 = arith.constant 0 : index
    %c0_1 = arith.constant 0 : index
    %4 = vector.load %arg1[%c0, %c0_1] : memref<16x128xf32, #tpu.memory_space<vmem>>, vector<16x128xf32>
    %c0_2 = arith.constant 0 : index
    %c0_3 = arith.constant 0 : index
    %5 = vector.load %arg2[%c0_2, %c0_3] : memref<16x128xf32, #tpu.memory_space<vmem>>, vector<16x128xf32>
    %6 = arith.subf %4, %5 : vector<16x128xf32>
    %7 = arith.mulf %6, %6 : vector<16x128xf32>
    %8 = vector.shape_cast %7 : vector<16x128xf32> to vector<2x8x128xf32>
    %cst_4 = arith.constant dense<0.000000e+00> : vector<8x128xf32>
    %9 = vector.multi_reduction <add>, %8, %cst_4 [0] : vector<2x8x128xf32> to vector<8x128xf32>
    %10 = arith.addf %3, %9 : vector<8x128xf32>
    %c0_5 = arith.constant 0 : index
    %c0_6 = arith.constant 0 : index
    %11 = vector.load %arg3[%c0_5, %c0_6] : memref<8x128xf32, #tpu.memory_space<vmem>>, vector<8x128xf32>
    %12 = arith.addf %11, %10 : vector<8x128xf32>
    %c0_7 = arith.constant 0 : index
    %c0_8 = arith.constant 0 : index
    %13 = vector.load %arg3[%c0_7, %c0_8] : memref<8x128xf32, #tpu.memory_space<vmem>>, vector<8x128xf32>
    tpu.vector_store %arg3[%c0_7, %c0_8], %12 {strides = array<i32>} : memref<8x128xf32, #tpu.memory_space<vmem>>, vector<8x128xf32>,
    return
  }
  func.func @transform_0(%arg0: i32) -> (i32, i32) {
    %c0_i32 = arith.constant 0 : i32
    %c0_i32_0 = arith.constant 0 : i32
    return %arg0, %c0_i32 : i32, i32
  }
  func.func @transform_1(%arg0: i32) -> (i32, i32) {
    %c0_i32 = arith.constant 0 : i32
    %c0_i32_0 = arith.constant 0 : i32
    return %arg0, %c0_i32 : i32, i32
  }
  func.func @transform_2(%arg0: i32) -> (i32, i32) {
    %c0_i32 = arith.constant 0 : i32
    %c0_i32_0 = arith.constant 0 : i32
    %c0_i32_1 = arith.constant 0 : i32
    return %c0_i32, %c0_i32_0 : i32, i32
  }
}

</mosaic_0001>

<bundles_post_ra>
// kernel: tpu_custom_call.1
= control target key start
LH: loop header
LB: loop body
LE: loop exit
PB: predicated region body
PF: predicated region fallthrough
CT: control target
= control target key end

     0   :  { %7 = vsyncpa [#allocation3], 0  ;;  %s208_s0 = inlined_call_operand.hbm [shape: f32[16,128], index: 0, kind: input, shape index: {}]   ;;  %s209_s1 = inlined_call_operand.hbm [shape: f32[16,128], index: 1, kind: input, shape index: {}]   ;;  %s210_s2 = inlined_call_operand.hbm [shape: f32[8,128], index: 2, kind: output, shape index: {}]  }
   0x1   :  { %8 = vsyncpa [#allocation6], 0 }
   0x2   :  { %9 = vsyncpa [#allocation4], 0  ;;  %s152_s9 = smov [#allocation2]   ;;  %s80_s13 = scalar_lea.hbm %s208_s0, 256 }
   0x3   :  { %s15_s10 = sshll.u32 %s152_s9, 4  ;;  %p81_p0 = scmp.ne.s32.totalorder %s208_s0, %s80_s13  ;;  %s16_s10 = int_to_ptr.vmem [resolvable:$true] %s15_s10 }
   0x4   :  { %p84_p1 = scmp.lt.u32.totalorder %s80_s13, %s208_s0 }
   0x6   :  { %p86_p2 = pnand %p84_p1, %p81_p0 }
   0x8   :  { %89 = shalt.err (!%p86_p2)
}
   0x9   :  { %s90_s18 = scalar_lea.vmem %s16_s10, 256  ;;  %p95_p4 = scmp.lt.s32.totalorder %s16_s10, %s16_s10 }
   0xa   :  { %p91_p3 = scmp.ne.s32.totalorder %s16_s10, %s90_s18  ;;  %p96_p5 = scmp.lt.s32.totalorder %s90_s18, %s90_s18 }
   0xc   :  { %p97_p6 = por %p96_p5, %p95_p4 }
   0xe   :  { %p98_p7 = pnand %p97_p6, %p91_p3 }
  0x10   :  { %101 = shalt.err (!%p98_p7)
}
  0x11   :  { %s153_s19 = smov 128   ;;  %s154_s20 = smov 8  }
  0x12   :  { %21 = dma.hbm_to_vmem [thread:$0]  %s208_s0, 256, %s16_s10, [#allocation3], %s153_s19, %s153_s19, %s154_s20  }
  0x13   :  { %s155_s23 = smov [#allocation5]   ;;  %s102_s27 = scalar_lea.hbm %s209_s1, 256 }
  0x14   :  { %s27_s24 = sshll.u32 %s155_s23, 4  ;;  %p103_p8 = scmp.ne.s32.totalorder %s209_s1, %s102_s27  ;;  %s28_s24 = int_to_ptr.vmem [resolvable:$true] %s27_s24 }
  0x15   :  { %p106_p9 = scmp.lt.u32.totalorder %s102_s27, %s209_s1 }
  0x17   :  { %p108_p10 = pnand %p106_p9, %p103_p8 }
  0x19   :  { %111 = shalt.err (!%p108_p10)
}
  0x1a   :  { %s112_s4 = scalar_lea.vmem %s28_s24, 256  ;;  %p117_p12 = scmp.lt.s32.totalorder %s28_s24, %s28_s24 }
  0x1b   :  { %p113_p11 = scmp.ne.s32.totalorder %s28_s24, %s112_s4  ;;  %p118_p13 = scmp.lt.s32.totalorder %s112_s4, %s112_s4 }
  0x1d   :  { %p119_p0 = por %p118_p13, %p117_p12 }
  0x1f   :  { %p120_p1 = pnand %p119_p0, %p113_p11 }
  0x21   :  { %123 = shalt.err (!%p120_p1)
}
  0x22   :  { %33 = dma.hbm_to_vmem [thread:$0]  %s209_s1, 256, %s28_s24, [#allocation6], %s153_s19, %s153_s19, %s154_s20  }
  0x23   :  { %146 = dma.done.wait [#allocation3], 256  }
  0x24   :  { %147 = vsyncadd [#allocation3], 4294967040 }
  0x25   :  { %148 = dma.done.wait [#allocation6], 256  }
  0x26   :  { %149 = vsyncadd [#allocation6], 4294967040  ;;  %v45_v0 = vld [vmem:[#allocation2] sm:$0xff]  ;;  %v46_v1 = vld [vmem:[#allocation2 + $0x8] sm:$0xff]  ;;  %s156_s6 = smov [#allocation7]  }
  0x27   :  { %v47_v2 = vld [vmem:[#allocation5] sm:$0xff]  ;;  %v48_v3 = vld [vmem:[#allocation5 + $0x8] sm:$0xff]  ;;  %s64_s7 = sshll.u32 %s156_s6, 4  ;;  %s65_s7 = int_to_ptr.vmem [resolvable:$true] %s64_s7 }
  0x28   :  { %v49_v4 = vsub.f32 %v45_v0, %v47_v2  ;;  %v50_v5 = vsub.f32 %v46_v1, %v48_v3  ;;  %s124_s8 = scalar_lea.vmem %s65_s7, 128  ;;  %p129_p3 = scmp.lt.s32.totalorder %s65_s7, %s65_s7 }
  0x29   :  { %p125_p2 = scmp.ne.s32.totalorder %s65_s7, %s124_s8  ;;  %p130_p4 = scmp.lt.s32.totalorder %s124_s8, %s124_s8 }
  0x2a   :  { %v51_v6 = vmul.f32 %v49_v4, %v49_v4  ;;  %v52_v7 = vmul.f32 %v50_v5, %v50_v5 }
  0x2b   :  { %p131_p5 = por %p130_p4, %p129_p3 }
  0x2c   :  { %v53_v8 = vadd.f32 %v52_v7, %v51_v6 }
  0x2d   :  { %p132_p6 = pnand %p131_p5, %p125_p2 }
  0x2e   :  { %57 = vst [vmem:[#allocation7] sm:$0xff] %v53_v8 }
  0x2f   :  { %135 = shalt.err (!%p132_p6)
}
  0x30   :  { %s136_s10 = scalar_lea.hbm %s210_s2, 128 }
  0x31   :  { %p137_p7 = scmp.ne.s32.totalorder %s210_s2, %s136_s10  ;;  %p140_p8 = scmp.lt.u32.totalorder %s136_s10, %s210_s2 }
  0x33   :  { %p142_p9 = pnand %p140_p8, %p137_p7 }
  0x35   :  { %145 = shalt.err (!%p142_p9)
}
  0x36   :  { %67 = dma.vmem_to_hbm [thread:$0]  %s65_s7, 128, %s210_s2, [#allocation4]  }
  0x37   :  { %150 = dma.done.wait [#allocation4], 128  }
  0x38   :  { %151 = vsyncadd [#allocation4], 4294967168 }
  0x39   :  { %71 = vsyncpa [#allocation3], 1 }
  0x3a   :  { %72 = vsyncpa [#allocation6], 1 }
  0x3b   :  { %73 = vsyncpa [#allocation4], 1 }

</bundles_post_ra>
